<compile_context>
chip_gen: v6e
topology: v6e:2x2x1
jax: 0.10.0
libtpu: 0.0.40
codegen_flags: <defaults>
</compile_context>

<pallas_src>
from functools import partial
import math

import jax
import jax.numpy as jnp
import numpy as np
from jax import lax
from jax.experimental import pallas as pl
from jax.experimental.pallas import tpu as pltpu

# TODO(synk): iob_labels_vocab_cls.stoi['<pad>'] is an external vocab constant;
# pinned to 0 deterministically for this self-contained script.
PAD_TAG_ID = 0


def _make_union_kernel(N: int, T: int, S: int, TP: int, SK: int, D: int, pad_tag: int):
    NPC = SK // T  # nodes covered by one contraction chunk

    def kernel(doc_len_ref, n_valid_ref,            # SMEM scalar prefetch: (B,) int32 each
               pos_ref, x_ref, xg_ref, tag_ref,     # inputs
               newx_ref, newmask_ref, newtag_ref,   # outputs
               accx_ref, acct_ref):                 # VMEM scratch accumulators
        i = pl.program_id(0)
        p = pl.program_id(1)
        k = pl.program_id(2)
        nk = pl.num_programs(2)

        @pl.when(k == 0)
        def _init():
            accx_ref[...] = jnp.zeros_like(accx_ref)
            acct_ref[...] = jnp.zeros_like(acct_ref)

        # ---- GCN expand as a VPU broadcast-add on this contraction chunk only.
        #      (SK, D) viewed as (NPC, T, D); relayout-free because T % 8 == 0.
        xc = x_ref[0]                                           # (SK, D) f32
        xg = xg_ref[0, pl.ds(k * NPC, NPC), :]                  # (NPC, D) f32
        summed = (xc.reshape(NPC, T, D) + xg[:, None, :]).reshape(SK, D)

        # ---- Selection block: one fused compare per element.
        #      sel[r, j] = (pos[j] - p*TP == r); pos == -1 (padding) never matches.
        rel = pos_ref[0] - p * TP                               # (1, SK) int32
        row = lax.broadcasted_iota(jnp.int32, (TP, 1), 0)       # (TP, 1)  int32
        sel = (row == rel).astype(jnp.float32)                  # (TP, SK) f32

        # ---- Stream compaction of token features: MXU matmul, accumulated over k.
        accx_ref[...] += jnp.dot(sel, summed, preferred_element_type=jnp.float32)

        # ---- Tag compaction on the MXU as well: contract (1,SK) x (TP,SK) over SK
        #      (trans-B) -> lane-dense (1, TP) row.  Exact for tag ids < 2^24.
        acct_ref[...] += lax.dot_general(
            tag_ref[0], sel,
            dimension_numbers=(((1,), (1,)), ((), ())),
            preferred_element_type=jnp.float32)

        @pl.when(k == nk - 1)
        def _finalize():
            doc_len = doc_len_ref[i]
            n_valid = n_valid_ref[i]
            newx_ref[0] = accx_ref[...].astype(newx_ref.dtype)
            out_pos = lax.broadcasted_iota(jnp.int32, (1, TP), 1) + p * TP
            # torch semantics: new_mask[:doc_seq_len] = 1 ; new_tag[:num_valid] = gathered.
            newmask_ref[0] = (out_pos < doc_len).astype(jnp.int32)
            gathered = (acct_ref[...] + 0.5).astype(jnp.int32)   # non-negative, exact
            newtag_ref[0] = jnp.where(out_pos < n_valid, gathered, jnp.int32(pad_tag))

    return kernel


def _round_up(a: int, b: int) -> int:
    return (a + b - 1) // b * b


def _largest_tile(total: int, quantum: int, target: int) -> int:
    """Largest multiple of `quantum` dividing `total`, bounded by max(target, quantum)."""
    best = quantum
    c = quantum
    lim = max(target, quantum)
    while c <= lim:
        if total % c == 0:
            best = c
        c += quantum
    return best


@partial(jax.jit, static_argnames=("tp", "sk"))
def union_layer(x, x_gcn, mask, length, tags, *, tp=None, sk=None):
    """Training-mode UnionLayer.forward.

    Returns padded (full-S) outputs plus doc_seq_len; the data-dependent truncation
    to max(doc_seq_len) is caller-side glue (dynamic output shapes cannot live inside
    jit), exactly mirroring torch's `[:, :max_doc_seq_len]`.
    """
    B, N, T, D = x.shape
    # TODO(synk): if T % 8 != 0 in the real model, pad T (with mask=0) here so the
    # in-kernel (SK,D)<->(NPC,T,D) views stay relayout-free.
    assert T % 8 == 0, "T must be a multiple of 8"

    # --- pad the node axis so S = N*T always has a multiple-of-128 tile divisor
    #     (never falls back to a full-S selection block).  Padded nodes have mask=0.
    node_q = math.lcm(T, 128) // T
    N_pad = _round_up(N, node_q)
    if N_pad != N:
        pn = N_pad - N
        x = jnp.pad(x, ((0, 0), (0, pn), (0, 0), (0, 0)))
        x_gcn = jnp.pad(x_gcn, ((0, 0), (0, pn), (0, 0)))
        mask = jnp.pad(mask, ((0, 0), (0, pn), (0, 0)))
        length = jnp.pad(length, ((0, 0), (0, pn)))
        tags = jnp.pad(tags, ((0, 0), (0, pn), (0, 0)))
    N = N_pad
    S = N * T

    if tp is None:
        target = 512
        if B == 1 and S >= 256:
            target = min(target, S // 2)   # keep n_p >= 2 so both v7x TCs get work
        tp = _largest_tile(S, 128, target)
    if sk is None:
        sk = _largest_tile(S, math.lcm(T, 128), 512)
    assert S % tp == 0 and tp % 128 == 0, (S, tp)
    assert S % sk == 0 and sk % T == 0 and (sk % 128 == 0 or sk == S), (S, sk, T)
    n_p, n_k = S // tp, S // sk

    x2 = x.reshape(B, S, D).astype(jnp.float32)
    xg = x_gcn.astype(jnp.float32)
    mask2 = mask.reshape(B, S).astype(jnp.int32)
    tagsf = tags.reshape(B, 1, S).astype(jnp.float32)   # exact for ids < 2^24

    # Prefix-sum (plain XLA) -> output slot of every valid token; -1 for padding.
    csum = jnp.cumsum(mask2, axis=-1)
    pos = jnp.where(mask2 > 0, csum - 1, -1).astype(jnp.int32).reshape(B, 1, S)
    n_valid = csum[:, -1].astype(jnp.int32)                      # (B,) mask count
    doc_seq_len = jnp.sum(length, axis=-1).astype(jnp.int32)     # (B,) torch's doc_seq_len

    grid_spec = pltpu.PrefetchScalarGridSpec(
        num_scalar_prefetch=2,
        grid=(B, n_p, n_k),
        in_specs=[
            pl.BlockSpec((1, 1, sk), lambda i, p, k, dl, nv: (i, 0, k)),   # pos
            pl.BlockSpec((1, sk, D), lambda i, p, k, dl, nv: (i, k, 0)),   # x
            pl.BlockSpec((1, N, D), lambda i, p, k, dl, nv: (i, 0, 0)),    # x_gcn (resident)
            pl.BlockSpec((1, 1, sk), lambda i, p, k, dl, nv: (i, 0, k)),   # tags (f32 row)
        ],
        out_specs=[
            pl.BlockSpec((1, tp, D), lambda i, p, k, dl, nv: (i, p, 0)),   # new_x
            pl.BlockSpec((1, 1, tp), lambda i, p, k, dl, nv: (i, 0, p)),   # new_mask (lane-dense)
            pl.BlockSpec((1, 1, tp), lambda i, p, k, dl, nv: (i, 0, p)),   # new_tag  (lane-dense)
        ],
        scratch_shapes=[
            pltpu.VMEM((tp, D), jnp.float32),   # new_x accumulator
            pltpu.VMEM((1, tp), jnp.float32),   # new_tag accumulator (lane-dense row)
        ],
    )

    # Derive a VMEM budget from (tp, sk, D): double-buffered inputs/outputs + scratch
    # + the (TP, SK) sel temporary, with 2x headroom, clamped to sane bounds.
    vmem_est = (2 * (sk * D * 4 + 2 * sk * 4 + N * D * 4 + tp * D * 4 + 2 * tp * 4)
                + tp * D * 4 + tp * 4 + 3 * tp * sk * 4)
    vmem_limit = int(min(100 * 1024 * 1024, max(32 * 1024 * 1024, 2 * vmem_est)))

    cost = pl.CostEstimate(
        flops=2 * B * S * S * (D + 1),           # compaction + tag matmuls
        transcendentals=0,
        bytes_accessed=B * (n_p * S * D * 4 + S * D * 4 + N * D * 4 + 4 * S * 4),
    )

    new_x, new_mask, new_tag = pl.pallas_call(
        _make_union_kernel(N, T, S, tp, sk, D, PAD_TAG_ID),
        out_shape=(
            jax.ShapeDtypeStruct((B, S, D), x.dtype),
            jax.ShapeDtypeStruct((B, 1, S), jnp.int32),
            jax.ShapeDtypeStruct((B, 1, S), jnp.int32),
        ),
        grid_spec=grid_spec,
        compiler_params=pltpu.CompilerParams(
            dimension_semantics=("parallel", "parallel", "arbitrary"),
            vmem_limit_bytes=vmem_limit,
        ),
        cost_estimate=cost,
    )(doc_seq_len, n_valid, pos, x2, xg, tagsf)

    return new_x, new_mask.reshape(B, S), doc_seq_len, new_tag.reshape(B, S)


def _reference(x, x_gcn, mask, length, tags):
    """NumPy reimplementation of the PyTorch forward (training branch)."""
    x, x_gcn, mask, length, tags = map(np.asarray, (x, x_gcn, mask, length, tags))
    B, N, T, D = x.shape
    S = N * T
    xr = x.reshape(B, S, D).copy()
    mr = mask.reshape(B, S)
    xg = np.repeat(x_gcn[:, :, None, :], T, axis=2).reshape(B, S, D)
    xr = xr + xg
    doc_seq_len = length.sum(-1)
    max_len = int(doc_seq_len.max())
    new_x = np.zeros_like(xr)
    new_mask = np.zeros((B, S), np.int32)
    tr = tags.reshape(B, S)
    new_tag = np.full((B, S), PAD_TAG_ID, np.int32)
    for i in range(B):
        sel = mr[i] == 1
        valid = xr[i][sel]
        nv = valid.shape[0]
        new_x[i, :nv] = valid
        new_mask[i, :doc_seq_len[i]] = 1
        new_tag[i, :nv] = tr[i][sel]
    return (new_x[:, :max_len], new_mask[:, :max_len],
            doc_seq_len.astype(np.int32), new_tag[:, :max_len])


if __name__ == "__main__":
    B, N, T, D = 2, 4, 64, 32        # S = N*T = 256
    key = jax.random.PRNGKey(0)
    k1, k2, k3, k4 = jax.random.split(key, 4)

    x = jax.random.normal(k1, (B, N, T, D), dtype=jnp.float32)
    x_gcn = jax.random.normal(k2, (B, N, D), dtype=jnp.float32)
    length = jax.random.randint(k3, (B, N), 1, T + 1, dtype=jnp.int32)        # (B, N), 1..T
    t_iota = jnp.arange(T, dtype=jnp.int32)[None, None, :]
    mask = (t_iota < length[:, :, None]).astype(jnp.int32)                    # (B, N, T)
    tags = jax.random.randint(k4, (B, N, T), 1, 6, dtype=jnp.int32)           # (B, N, T)

    # tp=sk=128 exercises both the output-row tiling (n_p=2) and the
    # contraction-axis accumulation (n_k=2); grid = (2, 2, 2).
    new_x, new_mask, doc_seq_len, new_tag = union_layer(
        x, x_gcn, mask, length, tags, tp=128, sk=128)
    jax.block_until_ready((new_x, new_mask, doc_seq_len, new_tag))

    # Data-dependent truncation `[:, :max_doc_seq_len]` is caller-side glue: a host
    # slice of the already-computed padded outputs, keeping the wrapper jittable.
    max_len = int(np.asarray(doc_seq_len).max())
    new_x_np = np.asarray(new_x)[:, :max_len, :]
    new_mask_np = np.asarray(new_mask)[:, :max_len]
    new_tag_np = np.asarray(new_tag)[:, :max_len]

    ref_x, ref_mask, ref_len, ref_tag = _reference(x, x_gcn, mask, length, tags)
    np.testing.assert_allclose(new_x_np, ref_x, rtol=1e-5, atol=1e-5)
    np.testing.assert_array_equal(new_mask_np, ref_mask)
    np.testing.assert_array_equal(np.asarray(doc_seq_len), ref_len)
    np.testing.assert_array_equal(new_tag_np, ref_tag)

    print("KERNEL_OK")
</pallas_src>

<mosaic_0001>
module attributes {stable_mosaic.version = 11 : i64} {
  func.func @kernel(%arg0: i32, %arg1: i32, %arg2: i32, %arg3: memref<2xi32, #tpu.memory_space<smem>>, %arg4: memref<2xi32, #tpu.memory_space<smem>>, %arg5: memref<1x1x128xi32, #tpu.memory_space<vmem>>, %arg6: memref<1x128x32xf32, #tpu.memory_space<vmem>>, %arg7: memref<1x4x32xf32, #tpu.memory_space<vmem>>, %arg8: memref<1x1x128xf32, #tpu.memory_space<vmem>>, %arg9: memref<1x128x32xf32, #tpu.memory_space<vmem>>, %arg10: memref<1x1x128xi32, #tpu.memory_space<vmem>>, %arg11: memref<1x1x128xi32, #tpu.memory_space<vmem>>, %arg12: memref<128x32xf32, #tpu.memory_space<vmem>>, %arg13: memref<1x128xf32, #tpu.memory_space<vmem>>) attributes {dimension_semantics = [#tpu.dimension_semantics<parallel>, #tpu.dimension_semantics<parallel>, #tpu.dimension_semantics<arbitrary>], iteration_bounds = array<i64: 2, 2, 2>, scalar_prefetch = 2 : i64, scratch_operands = 2 : i64, tpu.core_type = #tpu.core_type<tc>, window_params = [{transform_indices = @transform_0, window_bounds = array<i64: 1, 1, 128>}, {transform_indices = @transform_1, window_bounds = array<i64: 1, 128, 32>}, {transform_indices = @transform_2, window_bounds = array<i64: 1, 4, 32>}, {transform_indices = @transform_3, window_bounds = array<i64: 1, 1, 128>}, {transform_indices = @transform_4, window_bounds = array<i64: 1, 128, 32>}, {transform_indices = @transform_5, window_bounds = array<i64: 1, 1, 128>}, {transform_indices = @transform_6, window_bounds = array<i64: 1, 1, 128>}]} {
    %c0_i32 = arith.constant 0 : i32
    %0 = arith.cmpi eq, %arg2, %c0_i32 : i32
    %1 = arith.extui %0 : i1 to i32
    %c0_i32_0 = arith.constant 0 : i32
    %2 = arith.cmpi ne, %1, %c0_i32_0 : i32
    scf.if %2 {
      %cst_21 = arith.constant 0.000000e+00 : f32
      %38 = vector.broadcast %cst_21 : f32 to vector<128x32xf32>
      %c0_22 = arith.constant 0 : index
      %c0_23 = arith.constant 0 : index
      %39 = vector.load %arg12[%c0_22, %c0_23] : memref<128x32xf32, #tpu.memory_space<vmem>>, vector<128x32xf32>
      tpu.vector_store %arg12[%c0_22, %c0_23], %38 {strides = array<i32>} : memref<128x32xf32, #tpu.memory_space<vmem>>, vector<128x32xf32>,
      %cst_24 = arith.constant 0.000000e+00 : f32
      %40 = vector.broadcast %cst_24 : f32 to vector<1x128xf32>
      %c0_25 = arith.constant 0 : index
      %c0_26 = arith.constant 0 : index
      %41 = vector.load %arg13[%c0_25, %c0_26] : memref<1x128xf32, #tpu.memory_space<vmem>>, vector<1x128xf32>
      tpu.vector_store %arg13[%c0_25, %c0_26], %40 {strides = array<i32>} : memref<1x128xf32, #tpu.memory_space<vmem>>, vector<1x128xf32>,
    } else {
    }
    %c0 = arith.constant 0 : index
    %c0_1 = arith.constant 0 : index
    %c0_2 = arith.constant 0 : index
    %3 = vector.load %arg6[%c0, %c0_1, %c0_2] : memref<1x128x32xf32, #tpu.memory_space<vmem>>, vector<1x128x32xf32>
    %4 = vector.shape_cast %3 : vector<1x128x32xf32> to vector<128x32xf32>
    %c2_i32 = arith.constant 2 : i32
    %5 = arith.muli %arg2, %c2_i32 : i32
    %c0_3 = arith.constant 0 : index
    %6 = arith.index_cast %5 : i32 to index
    %c0_4 = arith.constant 0 : index
    %7 = vector.load %arg7[%c0_3, %6, %c0_4] : memref<1x4x32xf32, #tpu.memory_space<vmem>>, vector<1x2x32xf32>
    %8 = vector.shape_cast %7 : vector<1x2x32xf32> to vector<2x32xf32>
    %9 = vector.shape_cast %4 : vector<128x32xf32> to vector<2x64x32xf32>
    %10 = vector.shape_cast %8 : vector<2x32xf32> to vector<2x1x32xf32>
    %11 = vector.broadcast %10 : vector<2x1x32xf32> to vector<2x64x32xf32>
    %12 = arith.addf %9, %11 : vector<2x64x32xf32>
    %13 = vector.shape_cast %12 : vector<2x64x32xf32> to vector<128x32xf32>
    %c0_5 = arith.constant 0 : index
    %c0_6 = arith.constant 0 : index
    %c0_7 = arith.constant 0 : index
    %14 = vector.load %arg5[%c0_5, %c0_6, %c0_7] : memref<1x1x128xi32, #tpu.memory_space<vmem>>, vector<1x1x128xi32>
    %15 = vector.shape_cast %14 : vector<1x1x128xi32> to vector<1x128xi32>
    %c128_i32 = arith.constant 128 : i32
    %16 = arith.muli %arg1, %c128_i32 : i32
    %17 = vector.broadcast %16 : i32 to vector<1x128xi32>
    %18 = arith.subi %15, %17 : vector<1x128xi32>
    %19 = tpu.iota {dimensions = array<i32: 0>} : vector<128x1xi32>
    %20 = vector.broadcast %19 : vector<128x1xi32> to vector<128x128xi32>
    %21 = vector.broadcast %18 : vector<1x128xi32> to vector<128x128xi32>
    %22 = arith.cmpi eq, %20, %21 : vector<128x128xi32>
    %23 = arith.extui %22 : vector<128x128xi1> to vector<128x128xi32>
    %24 = arith.sitofp %23 : vector<128x128xi32> to vector<128x128xf32>
    %c0_8 = arith.constant 0 : index
    %c0_9 = arith.constant 0 : index
    %25 = vector.load %arg12[%c0_8, %c0_9] : memref<128x32xf32, #tpu.memory_space<vmem>>, vector<128x32xf32>
    %cst = arith.constant dense<0.000000e+00> : vector<128x32xf32>
    %26 = tpu.matmul %24, %13, %cst {dimension_numbers = #tpu.dot_dimension_numbers<[1], [0], [0], [1], [0, 0, 1, 1], [], []>} : vector<128x128xf32>, vector<128x32xf32>, vector<128x32xf32> -> vector<128x32xf32>
    %27 = arith.addf %25, %26 : vector<128x32xf32>
    %c0_10 = arith.constant 0 : index
    %c0_11 = arith.constant 0 : index
    %28 = vector.load %arg12[%c0_10, %c0_11] : memref<128x32xf32, #tpu.memory_space<vmem>>, vector<128x32xf32>
    tpu.vector_store %arg12[%c0_10, %c0_11], %27 {strides = array<i32>} : memref<128x32xf32, #tpu.memory_space<vmem>>, vector<128x32xf32>,
    %c0_12 = arith.constant 0 : index
    %c0_13 = arith.constant 0 : index
    %29 = vector.load %arg13[%c0_12, %c0_13] : memref<1x128xf32, #tpu.memory_space<vmem>>, vector<1x128xf32>
    %c0_14 = arith.constant 0 : index
    %c0_15 = arith.constant 0 : index
    %c0_16 = arith.constant 0 : index
    %30 = vector.load %arg8[%c0_14, %c0_15, %c0_16] : memref<1x1x128xf32, #tpu.memory_space<vmem>>, vector<1x1x128xf32>
    %31 = vector.shape_cast %30 : vector<1x1x128xf32> to vector<1x128xf32>
    %cst_17 = arith.constant dense<0.000000e+00> : vector<1x128xf32>
    %32 = tpu.matmul %31, %24, %cst_17 {dimension_numbers = #tpu.dot_dimension_numbers<[1], [1], [0], [0], [0, 0, 1, 0], [], []>} : vector<1x128xf32>, vector<128x128xf32>, vector<1x128xf32> -> vector<1x128xf32>
    %33 = arith.addf %29, %32 : vector<1x128xf32>
    %c0_18 = arith.constant 0 : index
    %c0_19 = arith.constant 0 : index
    %34 = vector.load %arg13[%c0_18, %c0_19] : memref<1x128xf32, #tpu.memory_space<vmem>>, vector<1x128xf32>
    tpu.vector_store %arg13[%c0_18, %c0_19], %33 {strides = array<i32>} : memref<1x128xf32, #tpu.memory_space<vmem>>, vector<1x128xf32>,
    %c1_i32 = arith.constant 1 : i32
    %35 = arith.cmpi eq, %arg2, %c1_i32 : i32
    %36 = arith.extui %35 : i1 to i32
    %c0_i32_20 = arith.constant 0 : i32
    %37 = arith.cmpi ne, %36, %c0_i32_20 : i32
    scf.if %37 {
      %38 = arith.index_cast %arg0 : i32 to index
      %39 = memref.load %arg3[%38] : memref<2xi32, #tpu.memory_space<smem>>
      %40 = arith.index_cast %arg0 : i32 to index
      %41 = memref.load %arg4[%40] : memref<2xi32, #tpu.memory_space<smem>>
      %c0_21 = arith.constant 0 : index
      %c0_22 = arith.constant 0 : index
      %42 = vector.load %arg12[%c0_21, %c0_22] : memref<128x32xf32, #tpu.memory_space<vmem>>, vector<128x32xf32>
      %c0_23 = arith.constant 0 : index
      %c0_24 = arith.constant 0 : index
      %c0_25 = arith.constant 0 : index
      %43 = vector.load %arg9[%c0_23, %c0_24, %c0_25] : memref<1x128x32xf32, #tpu.memory_space<vmem>>, vector<1x128x32xf32>
      %44 = vector.shape_cast %43 : vector<1x128x32xf32> to vector<128x32xf32>
      %45 = vector.shape_cast %42 : vector<128x32xf32> to vector<1x128x32xf32>
      tpu.vector_store %arg9[%c0_23, %c0_24, %c0_25], %45 {strides = array<i32>} : memref<1x128x32xf32, #tpu.memory_space<vmem>>, vector<1x128x32xf32>,
      %46 = tpu.iota {dimensions = array<i32: 1>} : vector<1x128xi32>
      %c128_i32_26 = arith.constant 128 : i32
      %47 = arith.muli %arg1, %c128_i32_26 : i32
      %48 = vector.broadcast %47 : i32 to vector<1x128xi32>
      %49 = arith.addi %46, %48 : vector<1x128xi32>
      %50 = vector.broadcast %39 : i32 to vector<1x128xi32>
      %51 = arith.cmpi slt, %49, %50 : vector<1x128xi32>
      %52 = arith.extui %51 : vector<1x128xi1> to vector<1x128xi32>
      %c0_27 = arith.constant 0 : index
      %c0_28 = arith.constant 0 : index
      %c0_29 = arith.constant 0 : index
      %53 = vector.load %arg10[%c0_27, %c0_28, %c0_29] : memref<1x1x128xi32, #tpu.memory_space<vmem>>, vector<1x1x128xi32>
      %54 = vector.shape_cast %53 : vector<1x1x128xi32> to vector<1x128xi32>
      %55 = vector.shape_cast %52 : vector<1x128xi32> to vector<1x1x128xi32>
      tpu.vector_store %arg10[%c0_27, %c0_28, %c0_29], %55 {strides = array<i32>} : memref<1x1x128xi32, #tpu.memory_space<vmem>>, vector<1x1x128xi32>,
      %c0_30 = arith.constant 0 : index
      %c0_31 = arith.constant 0 : index
      %56 = vector.load %arg13[%c0_30, %c0_31] : memref<1x128xf32, #tpu.memory_space<vmem>>, vector<1x128xf32>
      %cst_32 = arith.constant 5.000000e-01 : f32
      %57 = vector.broadcast %cst_32 : f32 to vector<1x128xf32>
      %58 = arith.addf %56, %57 : vector<1x128xf32>
      %59 = arith.fptosi %58 : vector<1x128xf32> to vector<1x128xi32>
      %60 = vector.broadcast %41 : i32 to vector<1x128xi32>
      %61 = arith.cmpi slt, %49, %60 : vector<1x128xi32>
      %c0_i32_33 = arith.constant 0 : i32
      %62 = vector.broadcast %c0_i32_33 : i32 to vector<1x128xi32>
      %63 = arith.select %61, %59, %62 : vector<1x128xi1>, vector<1x128xi32>
      %c0_34 = arith.constant 0 : index
      %c0_35 = arith.constant 0 : index
      %c0_36 = arith.constant 0 : index
      %64 = vector.load %arg11[%c0_34, %c0_35, %c0_36] : memref<1x1x128xi32, #tpu.memory_space<vmem>>, vector<1x1x128xi32>
      %65 = vector.shape_cast %64 : vector<1x1x128xi32> to vector<1x128xi32>
      %66 = vector.shape_cast %63 : vector<1x128xi32> to vector<1x1x128xi32>
      tpu.vector_store %arg11[%c0_34, %c0_35, %c0_36], %66 {strides = array<i32>} : memref<1x1x128xi32, #tpu.memory_space<vmem>>, vector<1x1x128xi32>,
    } else {
    }
    return
  }
  func.func @transform_0(%arg0: i32, %arg1: i32, %arg2: i32, %arg3: memref<2xi32, #tpu.memory_space<smem>>, %arg4: memref<2xi32, #tpu.memory_space<smem>>) -> (i32, i32, i32) {
    %c0_i32 = arith.constant 0 : i32
    %c0_i32_0 = arith.constant 0 : i32
    return %arg0, %c0_i32, %arg2 : i32, i32, i32
  }
  func.func @transform_1(%arg0: i32, %arg1: i32, %arg2: i32, %arg3: memref<2xi32, #tpu.memory_space<smem>>, %arg4: memref<2xi32, #tpu.memory_space<smem>>) -> (i32, i32, i32) {
    %c0_i32 = arith.constant 0 : i32
    %c0_i32_0 = arith.constant 0 : i32
    return %arg0, %arg2, %c0_i32 : i32, i32, i32
  }
  func.func @transform_2(%arg0: i32, %arg1: i32, %arg2: i32, %arg3: memref<2xi32, #tpu.memory_space<smem>>, %arg4: memref<2xi32, #tpu.memory_space<smem>>) -> (i32, i32, i32) {
    %c0_i32 = arith.constant 0 : i32
    %c0_i32_0 = arith.constant 0 : i32
    %c0_i32_1 = arith.constant 0 : i32
    return %arg0, %c0_i32, %c0_i32_0 : i32, i32, i32
  }
  func.func @transform_3(%arg0: i32, %arg1: i32, %arg2: i32, %arg3: memref<2xi32, #tpu.memory_space<smem>>, %arg4: memref<2xi32, #tpu.memory_space<smem>>) -> (i32, i32, i32) {
    %c0_i32 = arith.constant 0 : i32
    %c0_i32_0 = arith.constant 0 : i32
    return %arg0, %c0_i32, %arg2 : i32, i32, i32
  }
  func.func @transform_4(%arg0: i32, %arg1: i32, %arg2: i32, %arg3: memref<2xi32, #tpu.memory_space<smem>>, %arg4: memref<2xi32, #tpu.memory_space<smem>>) -> (i32, i32, i32) {
    %c0_i32 = arith.constant 0 : i32
    %c0_i32_0 = arith.constant 0 : i32
    return %arg0, %arg1, %c0_i32 : i32, i32, i32
  }
  func.func @transform_5(%arg0: i32, %arg1: i32, %arg2: i32, %arg3: memref<2xi32, #tpu.memory_space<smem>>, %arg4: memref<2xi32, #tpu.memory_space<smem>>) -> (i32, i32, i32) {
    %c0_i32 = arith.constant 0 : i32
    %c0_i32_0 = arith.constant 0 : i32
    return %arg0, %c0_i32, %arg1 : i32, i32, i32
  }
  func.func @transform_6(%arg0: i32, %arg1: i32, %arg2: i32, %arg3: memref<2xi32, #tpu.memory_space<smem>>, %arg4: memref<2xi32, #tpu.memory_space<smem>>) -> (i32, i32, i32) {
    %c0_i32 = arith.constant 0 : i32
    %c0_i32_0 = arith.constant 0 : i32
    return %arg0, %c0_i32, %arg1 : i32, i32, i32
  }
}

</mosaic_0001>

<bundles_post_ra>
// kernel: union_layer.1
= control target key start
LH: loop header
LB: loop body
LE: loop exit
PB: predicated region body
PF: predicated region fallthrough
CT: control target
= control target key end

     0   :  { %s1950_s0 = inlined_call_operand.vmem [shape: s32[2], index: 0, kind: input, shape index: {}]   ;;  %s1951_s2 = inlined_call_operand.vmem [shape: s32[2,1,256], index: 2, kind: input, shape index: {}]   ;;  %s1952_s3 = inlined_call_operand.vmem [shape: f32[2,256,32], index: 3, kind: input, shape index: {}]   ;;  %s1953_s4 = inlined_call_operand.vmem [shape: f32[2,4,32], index: 4, kind: input, shape index: {}]   ;;  %s1954_s5 = inlined_call_operand.vmem [shape: f32[2,1,256], index: 5, kind: input, shape index: {}]   ;;  %s1955_s6 = inlined_call_operand.vmem [shape: f32[2,256,32], index: 6, kind: output, shape index: {0}]   ;;  %s1956_s7 = inlined_call_operand.vmem [shape: s32[2,1,256], index: 7, kind: output, shape index: {1}]   ;;  %s1957_s8 = inlined_call_operand.vmem [shape: s32[2,1,256], index: 8, kind: output, shape index: {2}]   ;;  %s1958_s1 = inlined_call_operand.vmem [shape: s32[2], index: 1, kind: input, shape index: {}]  }
   0x1   :  { %s14_s29 = sshll.u32 %s1950_s0, 4  ;;  %s18_s10 = sshll.u32 %s1958_s1, 4  ;;  %s15_s29 = int_to_ptr.vmem [resolvable:$true] %s14_s29  ;;  %s19_s10 = int_to_ptr.vmem [resolvable:$true] %s18_s10 }
   0x2   :  { %s1402_s11 = scalar_lea.vmem %s15_s29, 16  ;;  %p1407_p1 = scmp.lt.s32.totalorder %s15_s29, %s15_s29 }
   0x3   :  { %p1403_p0 = scmp.ne.s32.totalorder %s15_s29, %s1402_s11  ;;  %p1408_p2 = scmp.lt.s32.totalorder %s1402_s11, %s1402_s11 }
   0x5   :  { %p1409_p3 = por %p1408_p2, %p1407_p1 }
   0x7   :  { %p1410_p4 = pnand %p1409_p3, %p1403_p0 }
   0x9   :  { %1413 = shalt.err (!%p1410_p4)  }
   0xa   :  { %s1484_s12 = smov [#allocation5]   ;;  %s1414_s13 = scalar_lea.vmem %s19_s10, 16 }
   0xb   :  { %17 = dma.vmem_to_smem %s15_s29, 16, %s1484_s12, [#allocation4] }
   0xc   :  { %p1415_p5 = scmp.ne.s32.totalorder %s19_s10, %s1414_s13  ;;  %p1419_p6 = scmp.lt.s32.totalorder %s19_s10, %s19_s10 }
   0xd   :  { %p1420_p7 = scmp.lt.s32.totalorder %s1414_s13, %s1414_s13 }
   0xf   :  { %p1421_p8 = por %p1420_p7, %p1419_p6 }
  0x11   :  { %p1422_p9 = pnand %p1421_p8, %p1415_p5 }
  0x13   :  { %1425 = shalt.err (!%p1422_p9)  }
  0x14   :  { %s1485_s0 = smov [#allocation6]  }
  0x15   :  { %21 = dma.vmem_to_smem %s19_s10, 16, %s1485_s0, [#allocation4] }
  0x16   :  { %1454 = dma.done.wait [#allocation4], 32 }
  0x17   :  { %1455 = vsyncadd [#allocation4], 4294967264 }
  0x18   :  { %23 = sfence }
  0x19   :  { %s1543_s1 = smov 0   ;;  %s1545_s14 = smov 0  }
  0x1a   :  { %s1547_s15 = smov 0   ;;  %s1549_s16 = smov 0  }
  0x1b   :  { %s1551_s17 = smov 0   ;;  %s1553_s18 = smov 0  }
  0x1c   :  { %s1555_s19 = smov 0  }
  0x1d LB: > { %1962 = sst [smem:[#allocation8_spill]] %s1470_s16  ;;  %s41_s20 = sadd.s32 1, %s1470_s16  ;;  %s1482_s19 = sphi %s1555_s19, %s29_s19   ;;  %s1478_s18 = sphi %s1553_s18, %s1974_s18   ;;  %s1474_s17 = sphi %s1551_s17, %s1973_s17   ;;  %s1470_s16 = sphi %s1549_s16, %s1972_s16   ;;  %s1466_s15 = sphi %s1547_s15, %s1971_s15   ;;  %s1462_s14 = sphi %s1545_s14, %s1970_s14   ;;  %s1458_s1 = sphi %s1543_s1, %s1969_s1  }
  0x1e   : > { %1963 = sst [smem:[#allocation9_spill]] %s1474_s17  ;;  %p42_p10 = scmp.ge.s32.totalorder %s41_s20, 2 }
  0x1f   : > { %1964 = sst [smem:[#allocation10_spill]] %s1478_s18  ;;  %s44_s21 = sadd.s32 1, %s1474_s17 }
  0x20   : > { %p1129_p11 = scmp.ge.s32.totalorder %s1482_s19, 1  ;;  %p298_p12 = scmp.lt.s32.totalorder %s1482_s19, 9 }
  0x21   : > { %s1976_s20 = smov (%p42_p10, %s41_s20), 0  ;;  %s1978_s21 = smov (!%p42_p10, %s44_s21), %s1474_s17 }
  0x22   : > { %1965 = sst [smem:[#allocation11_spill]] %s1976_s20  ;;  %p299_p13 = pnand %p1129_p11, %p298_p12 }
  0x23   : > { %p46_p0 = scmp.ge.s32.totalorder %s1978_s21, 2  ;;  %s48_s22 = sadd.s32 1, %s1478_s18 }
  0x24   : > { %p368_p2 = scmp.lt.s32.totalorder (!%p299_p13), %s1466_s15, 1  ;;  %p370_p3 = scmp.lt.s32.totalorder (!%p299_p13), %s1458_s1, 1 }
  0x25   : > { %s1980_s21 = smov (%p46_p0, %s1978_s21), 0  ;;  %s1982_s22 = smov (!%p46_p0, %s48_s22), %s1478_s18 }
  0x26   : > { %1966 = sst [smem:[#allocation12_spill]] %s1980_s21  ;;  %p50_p1 = scmp.ge.s32.totalorder %s1982_s22, 2 }
  0x27   : > { %302 = sbr.rel (%p299_p13) target bundleno = 355 (0x163), region = 36  ;;  %s1131_s23 = sshll.u32 (!%p299_p13), %s1458_s1, 4 }
  0x28   : > { %s1984_s22 = smov (%p50_p1, %s1982_s22), 0  ;;  %s1136_s24 = sshll.u32 (!%p299_p13), %s1462_s14, 4 }
  0x29   : > { %1967 = sst [smem:[#allocation13_spill]] %s1984_s22  ;;  %p378_p4 = scmp.lt.s32.totalorder (!%p299_p13), %s1131_s23, 31 }
  0x2a   : > { %p399_p5 = scmp.lt.s32.totalorder (!%p299_p13), %s1136_s24, 31  ;;  %p408_p6 = scmp.lt.s32.totalorder (!%p299_p13), %s1462_s14, 1 }
  0x2b   : > { %p1141_p7 = scmp.ne.s32.totalorder (!%p299_p13), %s1458_s1, 0 }
  0x2c   : > { %s369_s25 = scalar_select %p368_p2, %s1466_s15, 1 }
  0x2d   : > { %s371_s26 = scalar_select %p370_p3, %s1458_s1, 1 }
  0x2e   : > { %s1130_s27 = sshll.u32 %s369_s25, 1  ;;  %s1132_s29 = sshll.u32 %s369_s25, 5 }
  0x2f   : > { %s1597_s28 = sadd.s32 %s1130_s27, %s371_s26  ;;  %s1134_s11 = sshll.u32 %s369_s25, 2 }
  0x30   : > { %s1986_s23 = smov (!%p378_p4, %s1131_s23), 31  ;;  %s1606_s0 = scalar_lea.vmem %s1953_s4, %s1134_s11 }
  0x31   : > { %s395_s20 = scalar_lea.vmem %s1954_s5, %s1597_s28  ;;  %s381_s26 = sadd.s32 %s1132_s29, %s1986_s23 }
  0x32   : > { %s1133_s18 = sshll.u32 %s381_s26, 3  ;;  %s1988_s24 = smov (!%p399_p5, %s1136_s24), 31 }
  0x33   : > { %s1616_s30 = scalar_lea.vmem %s1952_s3, %s1133_s18  ;;  %s402_s9 = sadd.s32 %s1132_s29, %s1988_s24 }
  0x34   : > { %s409_s25 = scalar_select %p408_p6, %s1462_s14, 1 }
  0x35   : > { %s1138_s10 = sshll.u32 %s402_s9, 3  ;;  %423 = sbr.rel (%p1141_p7) target bundleno = 68 (0x44), region = 40 }
  0x36   : > { %s1619_s12 = sadd.s32 %s1130_s27, %s409_s25  ;;  %s1624_s21 = scalar_lea.vmem %s1955_s6, %s1138_s10 }
  0x37   : > { %s412_s26 = scalar_lea.vmem %s1956_s7, %s1619_s12  ;;  %s419_s18 = scalar_lea.vmem %s1957_s8, %s1619_s12 }
  0x3a   : > { %vm424_vm0 = vcmask 261120   ;;  %v1486_v0 = vmov 0.0  }
  0x3b   : > { %425 = vst.msk [vmem:[#allocation2] sm:$0xff] %vm424_vm0, %v1486_v0  ;;  %426 = vst.msk [vmem:[#allocation2 + $0x8] sm:$0xff] %vm424_vm0, %v1486_v0 }
  0x3c   : > { %427 = vst.msk [vmem:[#allocation2 + $0x10] sm:$0xff] %vm424_vm0, %v1486_v0  ;;  %428 = vst.msk [vmem:[#allocation2 + $0x18] sm:$0xff] %vm424_vm0, %v1486_v0 }
  0x3d   : > { %429 = vst.msk [vmem:[#allocation2 + $0x20] sm:$0xff] %vm424_vm0, %v1486_v0  ;;  %430 = vst.msk [vmem:[#allocation2 + $0x28] sm:$0xff] %vm424_vm0, %v1486_v0 }
  0x3e   : > { %431 = vst.msk [vmem:[#allocation2 + $0x30] sm:$0xff] %vm424_vm0, %v1486_v0  ;;  %432 = vst.msk [vmem:[#allocation2 + $0x38] sm:$0xff] %vm424_vm0, %v1486_v0 }
  0x3f   : > { %433 = vst.msk [vmem:[#allocation2 + $0x40] sm:$0xff] %vm424_vm0, %v1486_v0  ;;  %434 = vst.msk [vmem:[#allocation2 + $0x48] sm:$0xff] %vm424_vm0, %v1486_v0 }
  0x40   : > { %435 = vst.msk [vmem:[#allocation2 + $0x50] sm:$0xff] %vm424_vm0, %v1486_v0  ;;  %436 = vst.msk [vmem:[#allocation2 + $0x58] sm:$0xff] %vm424_vm0, %v1486_v0 }
  0x41   : > { %437 = vst.msk [vmem:[#allocation2 + $0x60] sm:$0xff] %vm424_vm0, %v1486_v0  ;;  %438 = vst.msk [vmem:[#allocation2 + $0x68] sm:$0xff] %vm424_vm0, %v1486_v0 }
  0x42   : > { %439 = vst.msk [vmem:[#allocation2 + $0x70] sm:$0xff] %vm424_vm0, %v1486_v0  ;;  %440 = vst.msk [vmem:[#allocation2 + $0x78] sm:$0xff] %vm424_vm0, %v1486_v0 }
  0x43   : > { %441 = vst [vmem:[#allocation3] sm:$0x1] %v1486_v0 }
  0x44 PF: > { %v473_v1 = vlaneseq  ;;  %s1968_s29 = scalar_lea.vmem %s1951_s2, %s1597_s28  ;;  %s1144_s10 = sshll.u32 %s1462_s14, 7  ;;  %v1487_v3 = vmov 0.0   ;;  %v1488_v7 = vmov 1966171168   ;;  %vm1489_vm1 = vmmov 0   ;;  %v457_v19 = vld [vmem:[%s1616_s30 + $0x78] sm:$0xff] }
  0x45   : > { %v510_v2 = vld [vmem:[%s1968_s29] sm:$0x1]  ;;  %1301 = vmatprep.subr.mxu1 %v1487_v3  ;;  %v1658_v4 = vstv %s1144_s10  ;;  %s1142_s25 = sshll.u32 %s1458_s1, 1  ;;  %v471_v8 = vunpack.c.l.s4 %v1488_v7  ;;  %1333 = vmatprep.mubr.msk.f32.mxu1 %vm1489_vm1, %v1487_v3  ;;  %v1490_v18 = vmov 1.0   ;;  %v456_v20 = vld [vmem:[%s1616_s30 + $0x70] sm:$0xff]  ;;  %v455_v23 = vld [vmem:[%s1616_s30 + $0x68] sm:$0xff] }
  0x46   : > { %v1662_v5 = vshrl.u32 %v473_v1, 7  ;;  %v513_v6 = vsub.s32 %v510_v2, %v1658_v4  ;;  %s459_s9 = scalar_lea.vmem %s1606_s0, %s1142_s25  ;;  %v454_v26 = vld [vmem:[%s1616_s30 + $0x60] sm:$0xff]  ;;  %v453_v29 = vld [vmem:[%s1616_s30 + $0x58] sm:$0xff]  ;;  %v452_v31 = vld [vmem:[%s1616_s30 + $0x50] sm:$0xff]  ;;  %p1193_p8 = scmp.ne.s32.totalorder %s1458_s1, 1 }
  0x47   : > { %v1143_v9 = vld.sshfl [vmem:[%s459_s9] sm:$0x11 pattern:$0x75316420]  ;;  %v472_v13 = vunpack.c.0.s8 %v471_v8  ;;  %v451_v35 = vld [vmem:[%s1616_s30 + $0x48] sm:$0xff]  ;;  %v449_v41 = vld [vmem:[%s1616_s30 + $0x38] sm:$0xff] }
  0x48   : > { %v486_v10 = vsub.s32 0, %v1662_v5  ;;  %v1669_v11 = vadd.s32 120, %v1662_v5  ;;  %v469_v12 = vcombine.high %v1143_v9, %v1143_v9  ;;  %v1675_v16 = vadd.s32 112, %v1662_v5  ;;  %v450_v37 = vld [vmem:[%s1616_s30 + $0x40] sm:$0xff]  ;;  %v448_v43 = vld [vmem:[%s1616_s30 + $0x30] sm:$0xff]  ;;  %v447_v46 = vld [vmem:[%s1616_s30 + $0x28] sm:$0xff] }
  0x49   : > { %v475_v15 = vsub.s32 %v472_v13, %v1662_v5  ;;  %v1689_v22 = vadd.s32 104, %v1662_v5  ;;  %v1707_v28 = vadd.s32 96, %v1662_v5  ;;  %v1719_v33 = vadd.s32 88, %v1662_v5  ;;  %v446_v48 = vld [vmem:[%s1616_s30 + $0x20] sm:$0xff]  ;;  %v445_v51 = vld [vmem:[%s1616_s30 + $0x18] sm:$0xff]  ;;  %v444_v53 = vld [vmem:[%s1616_s30 + $0x10] sm:$0xff] }
  0x4a   : > { %v1671_v14 = vrot.slane %v513_v6, %v486_v10  ;;  %v1731_v40 = vadd.s32 80, %v1662_v5  ;;  %v1743_v45 = vadd.s32 72, %v1662_v5  ;;  %v523_v50 = vadd.s32 64, %v1662_v5  ;;  %v443_v56 = vld [vmem:[%s1616_s30 + $0x8] sm:$0xff]  ;;  %v442_v58 = vld [vmem:[%s1616_s30] sm:$0xff]  ;;  %s1888_s1 = sld [smem:[#allocation6 + %s1466_s15]] (!%p1193_p8) }
  0x4b   : > { %v483_v17 = vrot.slane %v469_v12, %v475_v15  ;;  %v476_v34 = vrot.slane %v1143_v9, %v475_v15  ;;  %v522_v55 = vadd.s32 56, %v1662_v5  ;;  %v521_v60 = vadd.s32 48, %v1662_v5  ;;  %v778_v7 = vld [vmem:[%s395_s20] sm:$0x1]  ;;  %v586_v12 = vld [vmem:[#allocation2 + $0x18] sm:$0xff]  ;;  %s1878_s20 = sld [smem:[#allocation5 + %s1466_s15]] (!%p1193_p8) }
  0x4c   : > { %vm550_vm2 = vcmp.eq.s32.totalorder %v1669_v11, %v1671_v14  ;;  %vm549_vm3 = vcmp.eq.s32.totalorder %v1675_v16, %v1671_v14  ;;  %vm535_vm4 = vcmp.eq.s32.totalorder %v1662_v5, %v1671_v14  ;;  %vm548_vm5 = vcmp.eq.s32.totalorder %v1689_v22, %v1671_v14  ;;  %v583_v8 = vld [vmem:[#allocation2] sm:$0xff] }
  0x4d   : > { %1302 = vmatpush3.xpose.msk.msra.mxu1 %vm550_vm2, %v1490_v18  ;;  %v491_v21 = vrot.slane %v483_v17, %v486_v10  ;;  %1277 = vmatprep.mubr.msk.f32.mxu0 %vm535_vm4, %v1490_v18  ;;  %vm547_vm6 = vcmp.eq.s32.totalorder %v1707_v28, %v1671_v14  ;;  %vm546_vm7 = vcmp.eq.s32.totalorder %v1719_v33, %v1671_v14  ;;  %v516_v61 = vadd.s32 8, %v1662_v5  ;;  %v585_v17 = vld [vmem:[#allocation2 + $0x10] sm:$0xff] }
  0x4e   : > { %1303 = vmatprep.subr.mxu1 %v1487_v3  ;;  %v487_v39 = vrot.slane %v476_v34, %v486_v10  ;;  %vm545_vm8 = vcmp.eq.s32.totalorder %v1731_v40, %v1671_v14  ;;  %vm544_vm9 = vcmp.eq.s32.totalorder %v1743_v45, %v1671_v14  ;;  %vm543_vm10 = vcmp.eq.s32.totalorder %v523_v50, %v1671_v14  ;;  %v777_v45 = vld [vmem:[#allocation3] sm:$0x1] }
  0x4f   : > { %v509_v24 = vadd.f32 %v491_v21, %v457_v19  ;;  %v508_v25 = vadd.f32 %v491_v21, %v456_v20  ;;  %v507_v27 = vadd.f32 %v491_v21, %v455_v23  ;;  %v506_v30 = vadd.f32 %v491_v21, %v454_v26  ;;  %v588_v20 = vld [vmem:[#allocation2 + $0x28] sm:$0xff]  ;;  %v590_v23 = vld [vmem:[#allocation2 + $0x38] sm:$0xff]  ;;  %v589_v26 = vld [vmem:[#allocation2 + $0x30] sm:$0xff] }
  0x50   : > { %v505_v32 = vadd.f32 %v491_v21, %v453_v29  ;;  %v504_v36 = vadd.f32 %v491_v21, %v452_v31  ;;  %v503_v38 = vadd.f32 %v491_v21, %v451_v35  ;;  %v502_v42 = vadd.f32 %v491_v21, %v450_v37  ;;  %v592_v29 = vld [vmem:[#allocation2 + $0x48] sm:$0xff]  ;;  %v594_v35 = vld [vmem:[#allocation2 + $0x58] sm:$0xff] }
  0x51   : > { %1304 = vmatpush3.xpose.msk.msra.mxu1 %vm549_vm3, %v1490_v18  ;;  %1245 = vmatprep.subr.mxu0 %v509_v24  ;;  %v501_v44 = vadd.f32 %v487_v39, %v449_v41  ;;  %v500_v47 = vadd.f32 %v487_v39, %v448_v43  ;;  %v499_v49 = vadd.f32 %v487_v39, %v447_v46  ;;  %v517_v63 = vadd.s32 16, %v1662_v5  ;;  %v596_v41 = vld [vmem:[#allocation2 + $0x68] sm:$0xff] }
  0x52   : > { %1305 = vmatprep.subr.mxu1 %v1487_v3  ;;  %1246 = vmatpush3.msra.mxu0 %v509_v24  ;;  %v498_v52 = vadd.f32 %v487_v39, %v446_v48  ;;  %v497_v54 = vadd.f32 %v487_v39, %v445_v51  ;;  %v496_v57 = vadd.f32 %v487_v39, %v444_v53  ;;  %v520_v0 = vadd.s32 40, %v1662_v5  ;;  %v598_v48 = vld [vmem:[#allocation2 + $0x78] sm:$0xff]  ;;  %v597_v53 = vld [vmem:[#allocation2 + $0x70] sm:$0xff] }
  0x53   : > { %1247 = vmatprep.subr.mxu0 %v508_v25  ;;  %v495_v59 = vadd.f32 %v487_v39, %v443_v56  ;;  %vm542_vm11 = vcmp.eq.s32.totalorder %v522_v55, %v1671_v14  ;;  %v494_v62 = vadd.f32 %v487_v39, %v442_v58  ;;  %vm541_vm12 = vcmp.eq.s32.totalorder %v521_v60, %v1671_v14 }
  0x54   : > { %1248 = vmatpush3.msra.mxu0 %v508_v25  ;;  %vm536_vm13 = vcmp.eq.s32.totalorder %v516_v61, %v1671_v14  ;;  %v518_v2 = vadd.s32 24, %v1662_v5  ;;  %vm537_vm14 = vcmp.eq.s32.totalorder %v517_v63, %v1671_v14  ;;  %v519_v6 = vadd.s32 32, %v1662_v5 }
  0x55   : > { %1306 = vmatpush3.xpose.msk.msra.mxu1 %vm548_vm5, %v1490_v18  ;;  %1249 = vmatprep.subr.mxu0 %v507_v27  ;;  %vm540_vm15 = vcmp.eq.s32.totalorder %v520_v0, %v1671_v14 }
  0x56   : > { %1307 = vmatprep.subr.mxu1 %v1487_v3  ;;  %1250 = vmatpush3.msra.mxu0 %v507_v27  ;;  %vm538_vm0 = vcmp.eq.s32.totalorder %v518_v2, %v1671_v14  ;;  %vm539_vm1 = vcmp.eq.s32.totalorder %v519_v6, %v1671_v14 }
  0x57   : > { %1251 = vmatprep.subr.mxu0 %v506_v30 }
  0x58   : > { %1252 = vmatpush3.msra.mxu0 %v506_v30 }
  0x59   : > { %1308 = vmatpush3.xpose.msk.msra.mxu1 %vm547_vm6, %v1490_v18  ;;  %1253 = vmatprep.subr.mxu0 %v505_v32 }
  0x5a   : > { %1309 = vmatprep.subr.mxu1 %v1487_v3  ;;  %1254 = vmatpush3.msra.mxu0 %v505_v32  ;;  %v591_v32 = vld [vmem:[#allocation2 + $0x40] sm:$0xff] }
  0x5b   : > { %1255 = vmatprep.subr.mxu0 %v504_v36 }
  0x5c   : > { %1256 = vmatpush3.msra.mxu0 %v504_v36 }
  0x5d   : > { %1310 = vmatpush3.xpose.msk.msra.mxu1 %vm546_vm7, %v1490_v18  ;;  %1257 = vmatprep.subr.mxu0 %v503_v38 }
  0x5e   : > { %1311 = vmatprep.subr.mxu1 %v1487_v3  ;;  %1258 = vmatpush3.msra.mxu0 %v503_v38  ;;  %v593_v38 = vld [vmem:[#allocation2 + $0x50] sm:$0xff] }
  0x5f   : > { %1259 = vmatprep.subr.mxu0 %v502_v42 }
  0x60   : > { %1260 = vmatpush3.msra.mxu0 %v502_v42 }
  0x61   : > { %1312 = vmatpush3.xpose.msk.msra.mxu1 %vm545_vm8, %v1490_v18  ;;  %1261 = vmatprep.subr.mxu0 %v501_v44 }
  0x62   : > { %1313 = vmatprep.subr.mxu1 %v1487_v3  ;;  %1262 = vmatpush3.msra.mxu0 %v501_v44  ;;  %v595_v44 = vld [vmem:[#allocation2 + $0x60] sm:$0xff] }
  0x63   : > { %1263 = vmatprep.subr.mxu0 %v500_v47 }
  0x64   : > { %1264 = vmatpush3.msra.mxu0 %v500_v47 }
  0x65   : > { %1314 = vmatpush3.xpose.msk.msra.mxu1 %vm544_vm9, %v1490_v18  ;;  %1265 = vmatprep.subr.mxu0 %v499_v49 }
  0x66   : > { %1315 = vmatprep.subr.mxu1 %v1487_v3  ;;  %1266 = vmatpush3.msra.mxu0 %v499_v49 }
  0x67   : > { %1267 = vmatprep.subr.mxu0 %v498_v52 }
  0x68   : > { %1268 = vmatpush3.msra.mxu0 %v498_v52 }
  0x69   : > { %1316 = vmatpush3.xpose.msk.msra.mxu1 %vm543_vm10, %v1490_v18  ;;  %1269 = vmatprep.subr.mxu0 %v497_v54 }
  0x6a   : > { %1317 = vmatprep.subr.mxu1 %v1487_v3  ;;  %1270 = vmatpush3.msra.mxu0 %v497_v54 }
  0x6b   : > { %1271 = vmatprep.subr.mxu0 %v496_v57 }
  0x6c   : > { %1272 = vmatpush3.msra.mxu0 %v496_v57 }
  0x6d   : > { %1318 = vmatpush3.xpose.msk.msra.mxu1 %vm542_vm11, %v1490_v18  ;;  %1273 = vmatprep.subr.mxu0 %v495_v59 }
  0x6e   : > { %1319 = vmatprep.subr.mxu1 %v1487_v3  ;;  %1274 = vmatpush3.msra.mxu0 %v495_v59 }
  0x6f   : > { %1275 = vmatprep.subr.mxu0 %v494_v62 }
  0x70   : > { %1276 = vmatpush3.msra.mxu0 %v494_v62 }
  0x71   : > { %1320 = vmatpush3.xpose.msk.msra.mxu1 %vm541_vm12, %v1490_v18  ;;  %1278 = vmatmul.mubr.msk.f32.vlgmr.msra.gmra.mxu0 %vm536_vm13, %v1490_v18 }
  0x72   : > { %1321 = vmatprep.subr.mxu1 %v1487_v3  ;;  %1280 = vmatprep.mubr.msk.f32.mxu0 %vm537_vm14, %v1490_v18 }
  0x75   : > { %1322 = vmatpush3.xpose.msk.msra.mxu1 %vm540_vm15, %v1490_v18  ;;  %1281 = vmatmul.mubr.msk.f32.gmra.mxu0 %vm538_vm0, %v1490_v18 }
  0x76   : > { %1323 = vmatprep.subr.mxu1 %v1487_v3  ;;  %1283 = vmatprep.mubr.msk.f32.mxu0 %vm539_vm1, %v1490_v18 }
  0x79   : > { %1324 = vmatpush3.xpose.msk.msra.mxu1 %vm539_vm1, %v1490_v18  ;;  %1284 = vmatmul.mubr.msk.f32.gmra.mxu0 %vm540_vm15, %v1490_v18 }
  0x7a   : > { %1325 = vmatprep.subr.mxu1 %v1487_v3  ;;  %1286 = vmatprep.mubr.msk.f32.mxu0 %vm541_vm12, %v1490_v18 }
  0x7d   : > { %1326 = vmatpush3.xpose.msk.msra.mxu1 %vm538_vm0, %v1490_v18  ;;  %1287 = vmatmul.mubr.msk.f32.gmra.mxu0 %vm542_vm11, %v1490_v18 }
  0x7e   : > { %1327 = vmatprep.subr.mxu1 %v1487_v3  ;;  %1289 = vmatprep.mubr.msk.f32.mxu0 %vm543_vm10, %v1490_v18 }
  0x81   : > { %1328 = vmatpush3.xpose.msk.msra.mxu1 %vm537_vm14, %v1490_v18  ;;  %1290 = vmatmul.mubr.msk.f32.gmra.mxu0 %vm544_vm9, %v1490_v18 }
  0x82   : > { %1329 = vmatprep.subr.mxu1 %v1487_v3  ;;  %1292 = vmatprep.mubr.msk.f32.mxu0 %vm545_vm8, %v1490_v18 }
  0x85   : > { %1330 = vmatpush3.xpose.msk.msra.mxu1 %vm536_vm13, %v1490_v18  ;;  %1293 = vmatmul.mubr.msk.f32.gmra.mxu0 %vm546_vm7, %v1490_v18 }
  0x86   : > { %1331 = vmatprep.subr.mxu1 %v1487_v3  ;;  %1295 = vmatprep.mubr.msk.f32.mxu0 %vm547_vm6, %v1490_v18  ;;  %v584_v3 = vld [vmem:[#allocation2 + $0x8] sm:$0xff] }
  0x89   : > { %1332 = vmatpush3.xpose.msk.msra.mxu1 %vm535_vm4, %v1490_v18  ;;  %1296 = vmatmul.mubr.msk.f32.gmra.mxu0 %vm548_vm5, %v1490_v18  ;;  %vm760_vm4 = vcmask 261120  }
  0x8a   : > { %1298 = vmatprep.mubr.msk.f32.mxu0 %vm549_vm3, %v1490_v18 }
  0x8c   : > { %1334 = vmatmul.mubr.f32.vlgmr.msra.gmra.mxu1 %v778_v7 }
  0x8d   : > { %1299 = vmatmul.mubr.msk.f32.gmra.mxu0 %vm550_vm2, %v1490_v18  ;;  %v587_v18 = vld [vmem:[#allocation2 + $0x20] sm:$0xff] }
 0x131   : > { %v1279_v5 = vpop.f32.mrf.mxu0 }
 0x132   : > { %v745_v9 = vadd.f32 %v1279_v5, %v584_v3 }
 0x133   : > { %v665_v10 = vpop.f32.mrf.mxu0 }
 0x134   : > { %762 = vst.msk [vmem:[#allocation2 + $0x8] sm:$0xff] %vm760_vm4, %v745_v9  ;;  %v744_v13 = vadd.f32 %v665_v10, %v583_v8 }
 0x135   : > { %v1282_v15 = vpop.f32.mrf.mxu0 }
 0x136   : > { %761 = vst.msk [vmem:[#allocation2] sm:$0xff] %vm760_vm4, %v744_v13  ;;  %v747_v16 = vadd.f32 %v1282_v15, %v586_v12 }
 0x137   : > { %v675_v19 = vpop.f32.mrf.mxu0 }
 0x138   : > { %764 = vst.msk [vmem:[#allocation2 + $0x18] sm:$0xff] %vm760_vm4, %v747_v16  ;;  %v746_v11 = vadd.f32 %v675_v19, %v585_v17 }
 0x139   : > { %v1285_v14 = vpop.f32.mrf.mxu0 }
 0x13a   : > { %763 = vst.msk [vmem:[#allocation2 + $0x10] sm:$0xff] %vm760_vm4, %v746_v11  ;;  %v749_v21 = vadd.f32 %v1285_v14, %v588_v20 }
 0x13b   : > { %v685_v22 = vpop.f32.mrf.mxu0 }
 0x13c   : > { %766 = vst.msk [vmem:[#allocation2 + $0x28] sm:$0xff] %vm760_vm4, %v749_v21  ;;  %v748_v24 = vadd.f32 %v685_v22, %v587_v18 }
 0x13d   : > { %v1288_v25 = vpop.f32.mrf.mxu0 }
 0x13e   : > { %765 = vst.msk [vmem:[#allocation2 + $0x20] sm:$0xff] %vm760_vm4, %v748_v24  ;;  %v751_v27 = vadd.f32 %v1288_v25, %v590_v23 }
 0x13f   : > { %v695_v28 = vpop.f32.mrf.mxu0 }
 0x140   : > { %768 = vst.msk [vmem:[#allocation2 + $0x38] sm:$0xff] %vm760_vm4, %v751_v27  ;;  %v750_v30 = vadd.f32 %v695_v28, %v589_v26 }
 0x141   : > { %v1291_v31 = vpop.f32.mrf.mxu0 }
 0x142   : > { %767 = vst.msk [vmem:[#allocation2 + $0x30] sm:$0xff] %vm760_vm4, %v750_v30  ;;  %v753_v33 = vadd.f32 %v1291_v31, %v592_v29 }
 0x143   : > { %v705_v34 = vpop.f32.mrf.mxu0 }
 0x144   : > { %770 = vst.msk [vmem:[#allocation2 + $0x48] sm:$0xff] %vm760_vm4, %v753_v33  ;;  %v752_v36 = vadd.f32 %v705_v34, %v591_v32 }
 0x145   : > { %v1294_v37 = vpop.f32.mrf.mxu0 }
 0x146   : > { %769 = vst.msk [vmem:[#allocation2 + $0x40] sm:$0xff] %vm760_vm4, %v752_v36  ;;  %v755_v39 = vadd.f32 %v1294_v37, %v594_v35 }
 0x147   : > { %v715_v40 = vpop.f32.mrf.mxu0 }
 0x148   : > { %772 = vst.msk [vmem:[#allocation2 + $0x58] sm:$0xff] %vm760_vm4, %v755_v39  ;;  %v754_v42 = vadd.f32 %v715_v40, %v593_v38 }
 0x149   : > { %v1297_v43 = vpop.f32.mrf.mxu0 }
 0x14a   : > { %771 = vst.msk [vmem:[#allocation2 + $0x50] sm:$0xff] %vm760_vm4, %v754_v42  ;;  %v757_v46 = vadd.f32 %v1297_v43, %v596_v41 }
 0x14b   : > { %v725_v47 = vpop.f32.mrf.mxu0 }
 0x14c   : > { %v845_v49 = vpop.f32.mrf.mxu1  ;;  %774 = vst.msk [vmem:[#allocation2 + $0x68] sm:$0xff] %vm760_vm4, %v757_v46  ;;  %v756_v50 = vadd.f32 %v725_v47, %v595_v44 }
 0x14d   : > { %v849_v51 = vadd.f32 %v845_v49, %v777_v45  ;;  %v1300_v52 = vpop.f32.mrf.mxu0 }
 0x14e   : > { %v1335_v54 = vpop.f32.mrf.mxu1  ;;  %773 = vst.msk [vmem:[#allocation2 + $0x60] sm:$0xff] %vm760_vm4, %v756_v50  ;;  %v759_v55 = vadd.f32 %v1300_v52, %v598_v48  ;;  %854 = sbr.rel (%p1193_p8) target bundleno = 355 (0x163), region = 44 }
 0x14f   : > { %850 = vst [vmem:[#allocation3] sm:$0x1] %v849_v51  ;;  %v735_v56 = vpop.f32.mrf.mxu0 }
 0x150   : > { %776 = vst.msk [vmem:[#allocation2 + $0x78] sm:$0xff] %vm760_vm4, %v759_v55  ;;  %v758_v57 = vadd.f32 %v735_v56, %v597_v53 }
 0x152   : > { %775 = vst.msk [vmem:[#allocation2 + $0x70] sm:$0xff] %vm760_vm4, %v758_v57 }
 0x153   : > { %v857_v58 = vld [vmem:[#allocation2] sm:$0xff]  ;;  %v858_v59 = vld [vmem:[#allocation2 + $0x8] sm:$0xff]  ;;  %v859_v60 = vld [vmem:[#allocation2 + $0x10] sm:$0xff]  ;;  %v890_v61 = vand.u32 127, %v473_v1  ;;  %v892_v15 = vstv %s1878_s20  ;;  %v899_v16 = vstv %s1888_s1  ;;  %v1491_v19 = vmov 0  }
 0x154   : > { %873 = vst.msk [vmem:[%s1624_s21] sm:$0xff] %vm760_vm4, %v857_v58  ;;  %874 = vst.msk [vmem:[%s1624_s21 + $0x8] sm:$0xff] %vm760_vm4, %v858_v59  ;;  %v860_v62 = vld [vmem:[#allocation2 + $0x18] sm:$0xff]  ;;  %v861_v63 = vld [vmem:[#allocation2 + $0x20] sm:$0xff] }
 0x155   : > { %875 = vst.msk [vmem:[%s1624_s21 + $0x10] sm:$0xff] %vm760_vm4, %v859_v60  ;;  %v862_v0 = vld [vmem:[#allocation2 + $0x28] sm:$0xff]  ;;  %876 = vst.msk [vmem:[%s1624_s21 + $0x18] sm:$0xff] %vm760_vm4, %v860_v62  ;;  %v863_v1 = vld [vmem:[#allocation2 + $0x30] sm:$0xff]  ;;  %v891_v8 = vadd.s32 %v890_v61, %v1658_v4 }
 0x156   : > { %877 = vst.msk [vmem:[%s1624_s21 + $0x20] sm:$0xff] %vm760_vm4, %v861_v63  ;;  %878 = vst.msk [vmem:[%s1624_s21 + $0x28] sm:$0xff] %vm760_vm4, %v862_v0  ;;  %v864_v2 = vld [vmem:[#allocation2 + $0x38] sm:$0xff]  ;;  %v865_v6 = vld [vmem:[#allocation2 + $0x40] sm:$0xff] }
 0x157   : > { %879 = vst.msk [vmem:[%s1624_s21 + $0x30] sm:$0xff] %vm760_vm4, %v863_v1  ;;  %880 = vst.msk [vmem:[%s1624_s21 + $0x38] sm:$0xff] %vm760_vm4, %v864_v2  ;;  %v866_v7 = vld [vmem:[#allocation2 + $0x48] sm:$0xff]  ;;  %v867_v3 = vld [vmem:[#allocation2 + $0x50] sm:$0xff]  ;;  %vm893_vm2 = vcmp.lt.s32.totalorder %v891_v8, %v892_v15  ;;  %vm900_vm3 = vcmp.lt.s32.totalorder %v891_v8, %v899_v16 }
 0x158   : > { %881 = vst.msk [vmem:[%s1624_s21 + $0x40] sm:$0xff] %vm760_vm4, %v865_v6  ;;  %v868_v5 = vld [vmem:[#allocation2 + $0x58] sm:$0xff]  ;;  %882 = vst.msk [vmem:[%s1624_s21 + $0x48] sm:$0xff] %vm760_vm4, %v866_v7  ;;  %v869_v9 = vld [vmem:[#allocation2 + $0x60] sm:$0xff]  ;;  %v894_v20 = vsel %vm893_vm2, 1, %v1491_v19 }
 0x159   : > { %883 = vst.msk [vmem:[%s1624_s21 + $0x50] sm:$0xff] %vm760_vm4, %v867_v3  ;;  %884 = vst.msk [vmem:[%s1624_s21 + $0x58] sm:$0xff] %vm760_vm4, %v868_v5  ;;  %v870_v10 = vld [vmem:[#allocation2 + $0x68] sm:$0xff]  ;;  %v871_v12 = vld [vmem:[#allocation2 + $0x70] sm:$0xff] }
 0x15a   : > { %885 = vst.msk [vmem:[%s1624_s21 + $0x60] sm:$0xff] %vm760_vm4, %v869_v9  ;;  %886 = vst.msk [vmem:[%s1624_s21 + $0x68] sm:$0xff] %vm760_vm4, %v870_v10  ;;  %v872_v13 = vld [vmem:[#allocation2 + $0x78] sm:$0xff]  ;;  %v896_v4 = vld [vmem:[#allocation3] sm:$0x1] }
 0x15b   : > { %887 = vst.msk [vmem:[%s1624_s21 + $0x70] sm:$0xff] %vm760_vm4, %v871_v12  ;;  %888 = vst.msk [vmem:[%s1624_s21 + $0x78] sm:$0xff] %vm760_vm4, %v872_v13  ;;  %v897_v17 = vadd.f32 0.5, %v896_v4 }
 0x15c   : > { %895 = vst [vmem:[%s412_s26] sm:$0x1] %v894_v20 }
 0x15d   : > { %v1336_v11 = vtrunc.f32 %v897_v17 }
 0x15f   : > { %v1337_v14 = vcvt.f32.s32 %v1336_v11 }
 0x161   : > { %v901_v18 = vsel %vm900_vm3, %v1337_v14, 0 }
 0x162   : > { %902 = vst [vmem:[%s419_s18] sm:$0x1] %v901_v18 }
 0x163 PF: > { %s29_s19 = sadd.s32 1, %s1482_s19   ;;  %s1969_s1 = sld [smem:[#allocation8_spill]] }
 0x164   : > { %p26_p9 = scmp.ge.s32.totalorder %s29_s19, 10   ;;  %s1970_s14 = sld [smem:[#allocation9_spill]] }
 0x165   : > { %s1971_s15 = sld [smem:[#allocation10_spill]] }
 0x166   : > { %s1972_s16 = sld [smem:[#allocation11_spill]]  ;;  %28 = sbr.rel (!%p26_p9) target bundleno = 29 (0x1d), region = 108 }
 0x167   : > { %s1973_s17 = sld [smem:[#allocation12_spill]] }
 0x168   : > { %s1974_s18 = sld [smem:[#allocation13_spill]] }

</bundles_post_ra>
